<compile_context>
chip_gen: v7x
topology: tpu7x:2x2x1
jax: 0.10.0
libtpu: 0.0.40
codegen_flags: <defaults>
</compile_context>

<pallas_src>
import jax
import jax.numpy as jnp
from jax.experimental import pallas as pl
from jax.experimental.pallas import tpu as pltpu


# ---------------------------------------------------------------------------
# Kernels
# ---------------------------------------------------------------------------
def bitparm_kernel(x_ref, p_ref, o_ref):
    """non-final: y = x*softplus(h)+b ; out = y + tanh(y)*tanh(a)."""
    p = p_ref[...]                       # (tm, 3): [softplus(h), b, tanh(a)]
    sp_h = p[:, 0:1]
    b = p[:, 1:2]
    t_a = p[:, 2:3]
    x = x_ref[...].astype(jnp.float32)
    y = x * sp_h + b                     # lane-broadcast of per-row params
    o_ref[...] = (y + jnp.tanh(y) * t_a).astype(o_ref.dtype)


def bitparm_final_kernel(x_ref, p_ref, o_ref):
    """final: out = sigmoid(x*softplus(h)+b)."""
    p = p_ref[...]                       # (tm, 2): [softplus(h), b]
    sp_h = p[:, 0:1]
    b = p[:, 1:2]
    x = x_ref[...].astype(jnp.float32)
    z = x * sp_h + b
    # sigmoid(z) == 0.5*tanh(0.5*z) + 0.5 : one EUP op instead of exp + divide
    o_ref[...] = (0.5 * jnp.tanh(0.5 * z) + 0.5).astype(o_ref.dtype)


# ---------------------------------------------------------------------------
# Tiling policy
# ---------------------------------------------------------------------------
_TARGET_BLOCK_BYTES = 8 << 20        # ~8 MiB x-blocks (per-step overhead << DMA)
_MIN_SPLIT_BYTES = 1 << 20           # don't bother splitting tiny problems


def _choose_tiles(nc, hw, elem_bytes, sub_align):
    """VMEM-budget-driven block choice: maximize the lane (spatial) axis first,
    then grow rows until the block is ~_TARGET_BLOCK_BYTES."""
    # Lane axis: full HW if it fits the budget at the minimum row count,
    # otherwise the largest 128-aligned width that does.
    max_tn = max(128, _TARGET_BLOCK_BYTES // (sub_align * elem_bytes))
    if hw <= max_tn:
        tn = hw                                  # full dim -> no 128 constraint
    else:
        tn = (max_tn // 128) * 128
    # Sublane axis: as many rows as the budget allows.
    max_tm = max(sub_align, _TARGET_BLOCK_BYTES // (tn * elem_bytes))
    if nc <= max_tm:
        tm = nc                                  # full dim -> no align constraint
    else:
        tm = (max_tm // sub_align) * sub_align
    # Keep >=2 grid cells along one "parallel" axis on non-trivial problems so
    # v7x's two TensorCores can split the grid.
    if (pl.cdiv(nc, tm) == 1 and pl.cdiv(hw, tn) == 1
            and nc * hw * elem_bytes >= _MIN_SPLIT_BYTES):
        if tm >= 2 * sub_align:
            tm = ((tm // 2) // sub_align) * sub_align
        elif tn >= 256:
            tn = ((tn // 2) // 128) * 128
    return tm, tn


# ---------------------------------------------------------------------------
# Wrapper
# ---------------------------------------------------------------------------
def bitparm_forward(x_nchw, h, b, a=None, *, final=False):
    """PyTorch-compatible Bitparm forward. x is NCHW; h/b/a are (1, C, 1, 1)."""
    N, C, H, W = x_nchw.shape
    NC, HW = N * C, H * W

    # I/O dtype: keep bf16 end-to-end if the surrounding model is bf16 (halves
    # HBM traffic on this memory-bound op); otherwise stream f32.  Compute is
    # always f32 inside the kernel.
    io_dtype = jnp.bfloat16 if x_nchw.dtype == jnp.bfloat16 else jnp.float32
    elem_bytes = jnp.dtype(io_dtype).itemsize
    sub_align = 16 if io_dtype == jnp.bfloat16 else 8

    # (N,C,H,W) -> (N*C, H*W): zero-copy for NCHW layout; spatial axis on lanes.
    x2 = x_nchw.reshape(NC, HW).astype(io_dtype)

    # Precompute the per-channel transcendentals (only C values) and pack them
    # into one per-row (NC, P) f32 array: row r of x2 is channel r % C.
    sp_h = jax.nn.softplus(h.reshape(C).astype(jnp.float32))
    b_c = b.reshape(C).astype(jnp.float32)
    if final:
        params_c = jnp.stack([sp_h, b_c], axis=-1)                  # (C, 2)
    else:
        assert a is not None, "non-final Bitparm requires parameter `a`"
        t_a = jnp.tanh(a.reshape(C).astype(jnp.float32))
        params_c = jnp.stack([sp_h, b_c, t_a], axis=-1)             # (C, 3)
    params = jnp.tile(params_c, (N, 1))                             # (NC, P)
    P = params.shape[1]

    tm, tn = _choose_tiles(NC, HW, elem_bytes, sub_align)
    # NOTE: the spatial axis (j) must stay the LAST grid dimension: the param
    # block index (i, 0) is constant across consecutive j-steps, so Pallas
    # elides its re-DMA.  Do not swap the grid axes in a refactor.
    grid = (pl.cdiv(NC, tm), pl.cdiv(HW, tn))

    x_spec = pl.BlockSpec((tm, tn), lambda i, j: (i, j))
    p_spec = pl.BlockSpec((tm, P), lambda i, j: (i, 0))
    out_spec = pl.BlockSpec((tm, tn), lambda i, j: (i, j))

    # Double-buffered x-in + out blocks plus the tiny param buffer, with some
    # headroom, but kept well under v7x's 64 MiB physical VMEM per TC.
    block_bytes = tm * tn * elem_bytes
    vmem_limit = int(min(48 << 20, max(16 << 20, 4 * block_bytes + (4 << 20))))
    cparams = pltpu.CompilerParams(
        dimension_semantics=("parallel", "parallel"),
        vmem_limit_bytes=vmem_limit)

    NE = NC * HW
    cost = pl.CostEstimate(
        flops=(5 if final else 4) * NE,
        transcendentals=NE,                       # one tanh per element
        bytes_accessed=2 * NE * elem_bytes + NC * P * 4)

    kernel = bitparm_final_kernel if final else bitparm_kernel
    out2 = pl.pallas_call(
        kernel,
        out_shape=jax.ShapeDtypeStruct((NC, HW), io_dtype),
        grid=grid,
        in_specs=[x_spec, p_spec],
        out_specs=out_spec,
        compiler_params=cparams,
        cost_estimate=cost,
        # TODO(synk): optionally donate x2 via input_output_aliases={0: 0} when
        # this runs under jit on full-resolution activations (halves peak HBM
        # footprint for this tensor; traffic is unchanged).
    )(x2, params)

    return out2.reshape(N, C, H, W).astype(x_nchw.dtype)


# ---------------------------------------------------------------------------
# Params / reference / test
# ---------------------------------------------------------------------------
def make_bitparm_params(key, channel, final=False):
    """Matches the PyTorch init: normal(mean=0, std=0.01) for each param."""
    kh, kb, ka = jax.random.split(key, 3)
    h = 0.01 * jax.random.normal(kh, (1, channel, 1, 1), jnp.float32)
    b = 0.01 * jax.random.normal(kb, (1, channel, 1, 1), jnp.float32)
    a = None if final else 0.01 * jax.random.normal(ka, (1, channel, 1, 1),
                                                    jnp.float32)
    return h, b, a


def bitparm_reference(x, h, b, a=None, *, final=False):
    """Plain-JAX reference for validation."""
    sp_h = jax.nn.softplus(h)
    if final:
        return jax.nn.sigmoid(x * sp_h + b)
    y = x * sp_h + b
    return y + jnp.tanh(y) * jnp.tanh(a)


if __name__ == "__main__":
    key = jax.random.PRNGKey(0)
    kx, kp = jax.random.split(key)

    N, C, H, W = 2, 4, 16, 16
    x = jax.random.normal(kx, (N, C, H, W), jnp.float32)

    # non-final Bitparm (default path)
    h, b, a = make_bitparm_params(kp, C, final=False)
    out = jax.block_until_ready(bitparm_forward(x, h, b, a, final=False))
    ref = bitparm_reference(x, h, b, a, final=False)
    assert out.shape == (N, C, H, W)
    assert jnp.allclose(out, ref, atol=1e-5, rtol=1e-5), "non-final mismatch"

    # final Bitparm
    hf, bf, _ = make_bitparm_params(kp, C, final=True)
    out_f = jax.block_until_ready(bitparm_forward(x, hf, bf, final=True))
    ref_f = bitparm_reference(x, hf, bf, final=True)
    assert jnp.allclose(out_f, ref_f, atol=1e-5, rtol=1e-5), "final mismatch"

    print("KERNEL_OK")
</pallas_src>

<mosaic_0001>
module attributes {stable_mosaic.version = 11 : i64} {
  func.func @bitparm_kernel(%arg0: i32, %arg1: i32, %arg2: memref<8x256xf32, #tpu.memory_space<vmem>>, %arg3: memref<8x3xf32, #tpu.memory_space<vmem>>, %arg4: memref<8x256xf32, #tpu.memory_space<vmem>>) attributes {dimension_semantics = [#tpu.dimension_semantics<parallel>, #tpu.dimension_semantics<parallel>], iteration_bounds = array<i64: 1, 1>, scalar_prefetch = 0 : i64, scratch_operands = 0 : i64, tpu.core_type = #tpu.core_type<tc>, window_params = [{transform_indices = @transform_0, window_bounds = array<i64: 8, 256>}, {transform_indices = @transform_1, window_bounds = array<i64: 8, 3>}, {transform_indices = @transform_2, window_bounds = array<i64: 8, 256>}]} {
    %c0 = arith.constant 0 : index
    %c0_0 = arith.constant 0 : index
    %0 = vector.load %arg3[%c0, %c0_0] : memref<8x3xf32, #tpu.memory_space<vmem>>, vector<8x3xf32>
    %1 = vector.extract_strided_slice %0 {offsets = [0, 0], sizes = [8, 1], strides = [1, 1]} : vector<8x3xf32> to vector<8x1xf32>
    %2 = vector.extract_strided_slice %0 {offsets = [0, 1], sizes = [8, 1], strides = [1, 1]} : vector<8x3xf32> to vector<8x1xf32>
    %3 = vector.extract_strided_slice %0 {offsets = [0, 2], sizes = [8, 1], strides = [1, 1]} : vector<8x3xf32> to vector<8x1xf32>
    %c0_1 = arith.constant 0 : index
    %c0_2 = arith.constant 0 : index
    %4 = vector.load %arg2[%c0_1, %c0_2] : memref<8x256xf32, #tpu.memory_space<vmem>>, vector<8x256xf32>
    %5 = vector.broadcast %1 : vector<8x1xf32> to vector<8x256xf32>
    %6 = arith.mulf %4, %5 : vector<8x256xf32>
    %7 = vector.broadcast %2 : vector<8x1xf32> to vector<8x256xf32>
    %8 = arith.addf %6, %7 : vector<8x256xf32>
    %9 = math.tanh %8 : vector<8x256xf32>
    %10 = vector.broadcast %3 : vector<8x1xf32> to vector<8x256xf32>
    %11 = arith.mulf %9, %10 : vector<8x256xf32>
    %12 = arith.addf %8, %11 : vector<8x256xf32>
    %c0_3 = arith.constant 0 : index
    %c0_4 = arith.constant 0 : index
    %13 = vector.load %arg4[%c0_3, %c0_4] : memref<8x256xf32, #tpu.memory_space<vmem>>, vector<8x256xf32>
    tpu.vector_store %arg4[%c0_3, %c0_4], %12 {strides = array<i32>} : memref<8x256xf32, #tpu.memory_space<vmem>>, vector<8x256xf32>,
    return
  }
  func.func @transform_0(%arg0: i32, %arg1: i32) -> (i32, i32) {
    %c0_i32 = arith.constant 0 : i32
    return %arg0, %arg1 : i32, i32
  }
  func.func @transform_1(%arg0: i32, %arg1: i32) -> (i32, i32) {
    %c0_i32 = arith.constant 0 : i32
    %c0_i32_0 = arith.constant 0 : i32
    return %arg0, %c0_i32 : i32, i32
  }
  func.func @transform_2(%arg0: i32, %arg1: i32) -> (i32, i32) {
    %c0_i32 = arith.constant 0 : i32
    return %arg0, %arg1 : i32, i32
  }
}

</mosaic_0001>

<bundles_post_ra>
// kernel: tpu_custom_call.1
= control target key start
LH: loop header
LB: loop body
LE: loop exit
PB: predicated region body
PF: predicated region fallthrough
CT: control target
= control target key end

     0   :  { %7 = vsyncpa [#allocation3], 0  ;;  %s175_s0 = inlined_call_operand.hbm [shape: f32[8,256], index: 0, kind: input, shape index: {}]   ;;  %s176_s1 = inlined_call_operand.vmem [shape: f32[8,3], index: 1, kind: input, shape index: {}]   ;;  %s177_s2 = inlined_call_operand.hbm [shape: f32[8,256], index: 2, kind: output, shape index: {}]  }
   0x1   :  { %8 = vsyncpa [#allocation4], 0  ;;  %s128_s9 = smov [#allocation2]   ;;  %s80_s13 = scalar_lea.hbm %s175_s0, 256 }
   0x2   :  { %s15_s10 = sshll.u32 %s128_s9, 4  ;;  %p81_p0 = scmp.ne.s32.totalorder %s175_s0, %s80_s13  ;;  %s16_s10 = int_to_ptr.vmem [resolvable:$true] %s15_s10 }
   0x3   :  { %p84_p1 = scmp.lt.u32.totalorder %s80_s13, %s175_s0 }
   0x5   :  { %p86_p2 = pnand %p84_p1, %p81_p0 }
   0x7   :  { %89 = shalt.err (!%p86_p2)
}
   0x8   :  { %s90_s18 = scalar_lea.vmem %s16_s10, 256  ;;  %p95_p4 = scmp.lt.s32.totalorder %s16_s10, %s16_s10 }
   0x9   :  { %p91_p3 = scmp.ne.s32.totalorder %s16_s10, %s90_s18  ;;  %p96_p5 = scmp.lt.s32.totalorder %s90_s18, %s90_s18 }
   0xb   :  { %p97_p6 = por %p96_p5, %p95_p4 }
   0xd   :  { %p98_p7 = pnand %p97_p6, %p91_p3 }
   0xf   :  { %101 = shalt.err (!%p98_p7)
}
  0x10   :  { %18 = dma.hbm_to_vmem [thread:$0]  %s175_s0, 256, %s16_s10, [#allocation3]  }
  0x11   :  { %124 = dma.done.wait [#allocation3], 256  }
  0x12   :  { %125 = vsyncadd [#allocation3], 4294967040  ;;  %v129_v0 = vmov 0   ;;  %v130_v1 = vmov 2   ;;  %v24_v2 = vld [vmem:[%s176_s1] sm:$0xff]  ;;  %v131_v3 = vmov 1  }
  0x13   :  { %72 = vset.pattern.permute.xlu0 %v129_v0  ;;  %74 = vset.pattern.permute.xlu1 %v130_v1  ;;  %v25_v5 = vld [vmem:[#allocation2] sm:$0xff]  ;;  %v26_v6 = vld [vmem:[#allocation2 + $0x8] sm:$0xff]  ;;  %s132_s0 = smov [#allocation5]  }
  0x14   :  { %29 = vperm.xlu0 %72, %v24_v2   ;;  %43 = vperm.xlu1 %74, %v24_v2   ;;  %s58_s1 = sshll.u32 %s132_s0, 4  ;;  %s59_s1 = int_to_ptr.vmem [resolvable:$true] %s58_s1 }
  0x15   :  { %s102_s23 = scalar_lea.vmem %s59_s1, 256  ;;  %p107_p9 = scmp.lt.s32.totalorder %s59_s1, %s59_s1 }
  0x16   :  { %p103_p8 = scmp.ne.s32.totalorder %s59_s1, %s102_s23  ;;  %p108_p10 = scmp.lt.s32.totalorder %s102_s23, %s102_s23 }
  0x18   :  { %73 = vset.pattern.permute.xlu0 %v131_v3  ;;  %p109_p11 = por %p108_p10, %p107_p9 }
  0x19   :  { %35 = vperm.xlu0 %73, %v24_v2  }
  0x1a   :  { %p110_p12 = pnand %p109_p11, %p103_p8 }
  0x1d   :  { %75 = vset.pattern.permute.xlu0 %v130_v1 }
  0x93   :  { %v30_v4 = vpop.permute.xlu0 %29  ;;  %v44_v12 = vpop.permute.xlu1 %43 }
  0x94   :  { %v32_v7 = vmul.f32 %v30_v4, %v25_v5  ;;  %v33_v8 = vmul.f32 %v30_v4, %v26_v6 }
  0x98   :  { %v36_v9 = vpop.permute.xlu0 %35 }
  0x99   :  { %v38_v10 = vadd.f32 %v36_v9, %v32_v7  ;;  %v39_v11 = vadd.f32 %v36_v9, %v33_v8 }
  0x9b   :  { %76 = vtanh.f32 %v38_v10 }
  0x9c   :  { %78 = vtanh.f32 %v39_v11 }
  0xa5   :  { %v77_v13 = vpop.eup %76 }
  0xa6   :  { %v79_v14 = vpop.eup %78  ;;  %v46_v15 = vmul.f32 %v77_v13, %v44_v12 }
  0xa7   :  { %v47_v16 = vmul.f32 %v79_v14, %v44_v12 }
  0xa8   :  { %v48_v17 = vadd.f32 %v46_v15, %v38_v10 }
  0xa9   :  { %v49_v18 = vadd.f32 %v47_v16, %v39_v11 }
  0xaa   :  { %50 = vst [vmem:[#allocation5] sm:$0xff] %v48_v17 }
  0xab   :  { %51 = vst [vmem:[#allocation5 + $0x8] sm:$0xff] %v49_v18 }
  0xac   :  { %113 = shalt.err (!%p110_p12)
}
  0xad   :  { %s114_s26 = scalar_lea.hbm %s177_s2, 256 }
  0xae   :  { %p115_p13 = scmp.ne.s32.totalorder %s177_s2, %s114_s26  ;;  %p118_p0 = scmp.lt.u32.totalorder %s114_s26, %s177_s2 }
  0xb0   :  { %p120_p1 = pnand %p118_p0, %p115_p13 }
  0xb2   :  { %123 = shalt.err (!%p120_p1)
}
  0xb3   :  { %61 = dma.vmem_to_hbm [thread:$0]  %s59_s1, 256, %s177_s2, [#allocation4]  }
  0xb4   :  { %126 = dma.done.wait [#allocation4], 256  }
  0xb5   :  { %127 = vsyncadd [#allocation4], 4294967040 }
  0xb6   :  { %65 = vsyncpa [#allocation3], 1 }
  0xb7   :  { %66 = vsyncpa [#allocation4], 1 }

</bundles_post_ra>
